<compile_context>
chip_gen: v5e
topology: v5e:2x2
jax: 0.10.0
libtpu: 0.0.40
codegen_flags: <defaults>
</compile_context>

<pallas_src>
import functools
import math

import jax
import jax.numpy as jnp
from jax import lax
from jax.experimental import pallas as pl
from jax.experimental.pallas import tpu as pltpu

_TWO_PI = 2.0 * math.pi
_TARGET_BLOCK_BYTES = 2 * 1024 * 1024  # ~2 MiB per output block (x2 buffers)


def _mix32(x):
    """'lowbias32' uint32 -> uint32 hash (CPU/interpret fallback only)."""
    x = x ^ (x >> 16)
    x = x * jnp.uint32(0x7FEB352D)
    x = x ^ (x >> 15)
    x = x * jnp.uint32(0x846CA68B)
    x = x ^ (x >> 16)
    return x


def _noise_kernel(seed_ref, o_ref, *, std, use_hw_prng):
    tile_rows, lane = o_ref.shape

    if use_hw_prng:
        # Independent HW-PRNG stream per (seed, grid step): no chained state
        # across steps, so the grid axis can be sharded across TensorCores.
        pltpu.prng_seed(seed_ref[0], pl.program_id(0))

    def draw_bits(shape, salt):
        if use_hw_prng:
            bits = pltpu.prng_random_bits(shape)
            if bits.dtype != jnp.uint32:
                bits = pltpu.bitcast(bits, jnp.uint32)
            return bits
        # CPU / interpret-mode fallback: counter-based hash (pure VPU int ops).
        seed_u = seed_ref[0].astype(jnp.uint32)
        pid_u = pl.program_id(0).astype(jnp.uint32)
        key = _mix32((seed_u * jnp.uint32(0x9E3779B1))
                     ^ (pid_u * jnp.uint32(0x85EBCA77))
                     ^ jnp.uint32((salt * 0x68BC21EB) & 0xFFFFFFFF))
        r_i = lax.broadcasted_iota(jnp.uint32, shape, 0)
        c_i = lax.broadcasted_iota(jnp.uint32, shape, 1)
        ctr = r_i * jnp.uint32(shape[1]) + c_i
        return _mix32(_mix32(ctr ^ key))

    def gauss_pair(shape):
        """One Box-Muller draw -> (r*cos, r*sin), each of `shape`, ~N(0, std^2)."""
        b1 = draw_bits(shape, 1)
        b2 = draw_bits(shape, 2)
        # Mantissa trick: 23 random bits -> float in [1, 2); no int->fp convert.
        f1 = lax.bitcast_convert_type((b1 >> 9) | jnp.uint32(0x3F800000), jnp.float32)
        f2 = lax.bitcast_convert_type((b2 >> 9) | jnp.uint32(0x3F800000), jnp.float32)
        u1 = jnp.float32(2.0) - f1          # (0, 1]  -> log(u1) finite, no clamp
        u2 = f2 - jnp.float32(1.0)          # [0, 1)
        r = jnp.sqrt(jnp.float32(-2.0 * std * std) * jnp.log(u1))
        theta = jnp.float32(_TWO_PI) * u2
        return r * jnp.cos(theta), r * jnp.sin(theta)

    if tile_rows % 2 == 0:
        half = tile_rows // 2
        z0, z1 = gauss_pair((half, lane))
        o_ref[:half, :] = z0.astype(o_ref.dtype)
        o_ref[half:, :] = z1.astype(o_ref.dtype)
    else:
        # Odd row count only occurs for tiny single-block shapes: cos branch only.
        z0, _ = gauss_pair((tile_rows, lane))
        o_ref[...] = z0.astype(o_ref.dtype)


def _pick_tile_rows(rows: int, lane: int) -> int:
    """Largest clean tile (multiple of 16 rows, ~2 MiB) minimizing padding."""
    target = max(16, (_TARGET_BLOCK_BYTES // (lane * 4) // 16) * 16)
    if rows <= target:
        # Whole array fits in one block.  Split in two when it divides cleanly
        # so v7x's 2 TensorCores both get work; tiny/odd shapes take one block
        # equal to the full array (exempt from the (8,128) block constraint).
        if rows >= 32 and rows % 32 == 0:
            return rows // 2
        return rows
    t = target
    while t >= 16:
        if rows % t == 0:          # exact divisor -> no ragged tile, no padding
            return t
        t -= 16
    return target                  # ragged last tile (Pallas masks OOB rows)


def random_noise(input_ids: jax.Array, embedding_dim: int, seed: int = 0,
                 std: float = 0.1) -> jax.Array:
    """Pallas equivalent of RandomNoise.forward(input_ids): N(0, std), (B,S,D) f32."""
    B, S = input_ids.shape
    D = int(embedding_dim)
    total = B * S * D

    # Lane-dense output layout, chosen to make the final reshape metadata-only.
    if D % 128 == 0:
        lane, rows = D, B * S
        exact = True
    else:
        if total % 512 == 0:
            lane = 512
        elif total % 256 == 0:
            lane = 256
        else:
            lane = 128
        rows = pl.cdiv(total, lane)
        exact = (rows * lane == total)

    tile_rows = _pick_tile_rows(rows, lane)
    grid = (pl.cdiv(rows, tile_rows),)

    seed_arr = jnp.asarray([seed], dtype=jnp.int32)

    use_tpu = jax.default_backend() == "tpu"
    compiler_params = (
        pltpu.CompilerParams(dimension_semantics=("parallel",)) if use_tpu else None
    )

    flat = pl.pallas_call(
        functools.partial(_noise_kernel, std=float(std), use_hw_prng=use_tpu),
        out_shape=jax.ShapeDtypeStruct((rows, lane), jnp.float32),
        grid_spec=pltpu.PrefetchScalarGridSpec(
            num_scalar_prefetch=1,
            grid=grid,
            in_specs=[],
            out_specs=pl.BlockSpec((tile_rows, lane), lambda i, seed_ref: (i, 0)),
        ),
        compiler_params=compiler_params,
        cost_estimate=pl.CostEstimate(
            flops=10 * rows * lane,
            transcendentals=2 * rows * lane,
            bytes_accessed=4 * rows * lane,
        ),
    )(seed_arr)

    if exact:
        # i.i.d. noise -> reshape is semantically free and (here) metadata-only.
        return flat.reshape(B, S, D)
    # Rare fallback (total not a multiple of 128): slice off the padded tail.
    return flat.reshape(-1)[:total].reshape(B, S, D)


if __name__ == "__main__":
    key = jax.random.PRNGKey(0)
    B, S, D = 2, 8, 32

    # input_ids: integer token ids (only their shape matters to the module).
    input_ids = jax.random.randint(key, (B, S), minval=0, maxval=1000, dtype=jnp.int32)

    noise = random_noise(input_ids, embedding_dim=D, seed=0)
    noise = jax.block_until_ready(noise)

    assert noise.shape == (B, S, D), noise.shape
    assert noise.dtype == jnp.float32, noise.dtype
    assert bool(jnp.all(jnp.isfinite(noise)))

    mean = float(jnp.mean(noise))
    stdv = float(jnp.std(noise))
    assert abs(mean) < 0.05, mean          # ~N(0, 0.1) sanity (loose bounds)
    assert 0.05 < stdv < 0.2, stdv

    # Determinism: same seed -> identical noise.
    noise2 = jax.block_until_ready(random_noise(input_ids, embedding_dim=D, seed=0))
    assert bool(jnp.array_equal(noise, noise2))

    print("KERNEL_OK")
</pallas_src>

<mosaic_0001>
module attributes {stable_mosaic.version = 11 : i64} {
  func.func @_noise_kernel(%arg0: i32, %arg1: memref<1xi32, #tpu.memory_space<smem>>, %arg2: memref<1x512xf32, #tpu.memory_space<vmem>>) attributes {dimension_semantics = [#tpu.dimension_semantics<arbitrary>], iteration_bounds = array<i64: 1>, scalar_prefetch = 1 : i64, scratch_operands = 0 : i64, tpu.core_type = #tpu.core_type<tc>, window_params = [{transform_indices = @transform_0, window_bounds = array<i64: 1, 512>}]} {
    %c0 = arith.constant 0 : index
    %0 = memref.load %arg1[%c0] : memref<1xi32, #tpu.memory_space<smem>>
    %c-1640531535_i32 = arith.constant -1640531535 : i32
    %1 = arith.muli %0, %c-1640531535_i32 : i32
    %c-2048144777_i32 = arith.constant -2048144777 : i32
    %2 = arith.muli %arg0, %c-2048144777_i32 : i32
    %3 = arith.xori %1, %2 : i32
    %c1757159915_i32 = arith.constant 1757159915 : i32
    %4 = arith.xori %3, %c1757159915_i32 : i32
    %c16_i32 = arith.constant 16 : i32
    %5 = arith.shrui %4, %c16_i32 : i32
    %6 = arith.xori %4, %5 : i32
    %c2146121005_i32 = arith.constant 2146121005 : i32
    %7 = arith.muli %6, %c2146121005_i32 : i32
    %c15_i32 = arith.constant 15 : i32
    %8 = arith.shrui %7, %c15_i32 : i32
    %9 = arith.xori %7, %8 : i32
    %c-2073254261_i32 = arith.constant -2073254261 : i32
    %10 = arith.muli %9, %c-2073254261_i32 : i32
    %c16_i32_0 = arith.constant 16 : i32
    %11 = arith.shrui %10, %c16_i32_0 : i32
    %12 = arith.xori %10, %11 : i32
    %13 = tpu.iota {dimensions = array<i32: 0>} : vector<1x512xi32>
    %14 = tpu.iota {dimensions = array<i32: 1>} : vector<1x512xi32>
    %c512_i32 = arith.constant 512 : i32
    %15 = vector.broadcast %c512_i32 : i32 to vector<1x512xi32>
    %16 = arith.muli %13, %15 : vector<1x512xi32>
    %17 = arith.addi %16, %14 : vector<1x512xi32>
    %18 = vector.broadcast %12 : i32 to vector<1x512xi32>
    %19 = arith.xori %17, %18 : vector<1x512xi32>
    %c16_i32_1 = arith.constant 16 : i32
    %20 = vector.broadcast %c16_i32_1 : i32 to vector<1x512xi32>
    %21 = arith.shrui %19, %20 : vector<1x512xi32>
    %22 = arith.xori %19, %21 : vector<1x512xi32>
    %c2146121005_i32_2 = arith.constant 2146121005 : i32
    %23 = vector.broadcast %c2146121005_i32_2 : i32 to vector<1x512xi32>
    %24 = arith.muli %22, %23 : vector<1x512xi32>
    %c15_i32_3 = arith.constant 15 : i32
    %25 = vector.broadcast %c15_i32_3 : i32 to vector<1x512xi32>
    %26 = arith.shrui %24, %25 : vector<1x512xi32>
    %27 = arith.xori %24, %26 : vector<1x512xi32>
    %c-2073254261_i32_4 = arith.constant -2073254261 : i32
    %28 = vector.broadcast %c-2073254261_i32_4 : i32 to vector<1x512xi32>
    %29 = arith.muli %27, %28 : vector<1x512xi32>
    %c16_i32_5 = arith.constant 16 : i32
    %30 = vector.broadcast %c16_i32_5 : i32 to vector<1x512xi32>
    %31 = arith.shrui %29, %30 : vector<1x512xi32>
    %32 = arith.xori %29, %31 : vector<1x512xi32>
    %c16_i32_6 = arith.constant 16 : i32
    %33 = vector.broadcast %c16_i32_6 : i32 to vector<1x512xi32>
    %34 = arith.shrui %32, %33 : vector<1x512xi32>
    %35 = arith.xori %32, %34 : vector<1x512xi32>
    %c2146121005_i32_7 = arith.constant 2146121005 : i32
    %36 = vector.broadcast %c2146121005_i32_7 : i32 to vector<1x512xi32>
    %37 = arith.muli %35, %36 : vector<1x512xi32>
    %c15_i32_8 = arith.constant 15 : i32
    %38 = vector.broadcast %c15_i32_8 : i32 to vector<1x512xi32>
    %39 = arith.shrui %37, %38 : vector<1x512xi32>
    %40 = arith.xori %37, %39 : vector<1x512xi32>
    %c-2073254261_i32_9 = arith.constant -2073254261 : i32
    %41 = vector.broadcast %c-2073254261_i32_9 : i32 to vector<1x512xi32>
    %42 = arith.muli %40, %41 : vector<1x512xi32>
    %c16_i32_10 = arith.constant 16 : i32
    %43 = vector.broadcast %c16_i32_10 : i32 to vector<1x512xi32>
    %44 = arith.shrui %42, %43 : vector<1x512xi32>
    %45 = arith.xori %42, %44 : vector<1x512xi32>
    %c0_11 = arith.constant 0 : index
    %46 = memref.load %arg1[%c0_11] : memref<1xi32, #tpu.memory_space<smem>>
    %c-1640531535_i32_12 = arith.constant -1640531535 : i32
    %47 = arith.muli %46, %c-1640531535_i32_12 : i32
    %c-2048144777_i32_13 = arith.constant -2048144777 : i32
    %48 = arith.muli %arg0, %c-2048144777_i32_13 : i32
    %49 = arith.xori %47, %48 : i32
    %c-780647466_i32 = arith.constant -780647466 : i32
    %50 = arith.xori %49, %c-780647466_i32 : i32
    %c16_i32_14 = arith.constant 16 : i32
    %51 = arith.shrui %50, %c16_i32_14 : i32
    %52 = arith.xori %50, %51 : i32
    %c2146121005_i32_15 = arith.constant 2146121005 : i32
    %53 = arith.muli %52, %c2146121005_i32_15 : i32
    %c15_i32_16 = arith.constant 15 : i32
    %54 = arith.shrui %53, %c15_i32_16 : i32
    %55 = arith.xori %53, %54 : i32
    %c-2073254261_i32_17 = arith.constant -2073254261 : i32
    %56 = arith.muli %55, %c-2073254261_i32_17 : i32
    %c16_i32_18 = arith.constant 16 : i32
    %57 = arith.shrui %56, %c16_i32_18 : i32
    %58 = arith.xori %56, %57 : i32
    %59 = tpu.iota {dimensions = array<i32: 0>} : vector<1x512xi32>
    %60 = tpu.iota {dimensions = array<i32: 1>} : vector<1x512xi32>
    %c512_i32_19 = arith.constant 512 : i32
    %61 = vector.broadcast %c512_i32_19 : i32 to vector<1x512xi32>
    %62 = arith.muli %59, %61 : vector<1x512xi32>
    %63 = arith.addi %62, %60 : vector<1x512xi32>
    %64 = vector.broadcast %58 : i32 to vector<1x512xi32>
    %65 = arith.xori %63, %64 : vector<1x512xi32>
    %c16_i32_20 = arith.constant 16 : i32
    %66 = vector.broadcast %c16_i32_20 : i32 to vector<1x512xi32>
    %67 = arith.shrui %65, %66 : vector<1x512xi32>
    %68 = arith.xori %65, %67 : vector<1x512xi32>
    %c2146121005_i32_21 = arith.constant 2146121005 : i32
    %69 = vector.broadcast %c2146121005_i32_21 : i32 to vector<1x512xi32>
    %70 = arith.muli %68, %69 : vector<1x512xi32>
    %c15_i32_22 = arith.constant 15 : i32
    %71 = vector.broadcast %c15_i32_22 : i32 to vector<1x512xi32>
    %72 = arith.shrui %70, %71 : vector<1x512xi32>
    %73 = arith.xori %70, %72 : vector<1x512xi32>
    %c-2073254261_i32_23 = arith.constant -2073254261 : i32
    %74 = vector.broadcast %c-2073254261_i32_23 : i32 to vector<1x512xi32>
    %75 = arith.muli %73, %74 : vector<1x512xi32>
    %c16_i32_24 = arith.constant 16 : i32
    %76 = vector.broadcast %c16_i32_24 : i32 to vector<1x512xi32>
    %77 = arith.shrui %75, %76 : vector<1x512xi32>
    %78 = arith.xori %75, %77 : vector<1x512xi32>
    %c16_i32_25 = arith.constant 16 : i32
    %79 = vector.broadcast %c16_i32_25 : i32 to vector<1x512xi32>
    %80 = arith.shrui %78, %79 : vector<1x512xi32>
    %81 = arith.xori %78, %80 : vector<1x512xi32>
    %c2146121005_i32_26 = arith.constant 2146121005 : i32
    %82 = vector.broadcast %c2146121005_i32_26 : i32 to vector<1x512xi32>
    %83 = arith.muli %81, %82 : vector<1x512xi32>
    %c15_i32_27 = arith.constant 15 : i32
    %84 = vector.broadcast %c15_i32_27 : i32 to vector<1x512xi32>
    %85 = arith.shrui %83, %84 : vector<1x512xi32>
    %86 = arith.xori %83, %85 : vector<1x512xi32>
    %c-2073254261_i32_28 = arith.constant -2073254261 : i32
    %87 = vector.broadcast %c-2073254261_i32_28 : i32 to vector<1x512xi32>
    %88 = arith.muli %86, %87 : vector<1x512xi32>
    %c16_i32_29 = arith.constant 16 : i32
    %89 = vector.broadcast %c16_i32_29 : i32 to vector<1x512xi32>
    %90 = arith.shrui %88, %89 : vector<1x512xi32>
    %91 = arith.xori %88, %90 : vector<1x512xi32>
    %c9_i32 = arith.constant 9 : i32
    %92 = vector.broadcast %c9_i32 : i32 to vector<1x512xi32>
    %93 = arith.shrui %45, %92 : vector<1x512xi32>
    %c1065353216_i32 = arith.constant 1065353216 : i32
    %94 = vector.broadcast %c1065353216_i32 : i32 to vector<1x512xi32>
    %95 = arith.ori %93, %94 : vector<1x512xi32>
    %96 = tpu.bitcast %95 : vector<1x512xi32> -> vector<1x512xf32>
    %c9_i32_30 = arith.constant 9 : i32
    %97 = vector.broadcast %c9_i32_30 : i32 to vector<1x512xi32>
    %98 = arith.shrui %91, %97 : vector<1x512xi32>
    %c1065353216_i32_31 = arith.constant 1065353216 : i32
    %99 = vector.broadcast %c1065353216_i32_31 : i32 to vector<1x512xi32>
    %100 = arith.ori %98, %99 : vector<1x512xi32>
    %101 = tpu.bitcast %100 : vector<1x512xi32> -> vector<1x512xf32>
    %cst = arith.constant 2.000000e+00 : f32
    %102 = vector.broadcast %cst : f32 to vector<1x512xf32>
    %103 = arith.subf %102, %96 : vector<1x512xf32>
    %cst_32 = arith.constant 1.000000e+00 : f32
    %104 = vector.broadcast %cst_32 : f32 to vector<1x512xf32>
    %105 = arith.subf %101, %104 : vector<1x512xf32>
    %106 = math.log %103 : vector<1x512xf32>
    %cst_33 = arith.constant -2.000000e-02 : f32
    %107 = vector.broadcast %cst_33 : f32 to vector<1x512xf32>
    %108 = arith.mulf %107, %106 : vector<1x512xf32>
    %109 = math.sqrt %108 : vector<1x512xf32>
    %cst_34 = arith.constant 6.28318548 : f32
    %110 = vector.broadcast %cst_34 : f32 to vector<1x512xf32>
    %111 = arith.mulf %110, %105 : vector<1x512xf32>
    %112 = math.cos %111 : vector<1x512xf32>
    %113 = arith.mulf %109, %112 : vector<1x512xf32>
    %c0_35 = arith.constant 0 : index
    %c0_36 = arith.constant 0 : index
    %114 = vector.load %arg2[%c0_35, %c0_36] : memref<1x512xf32, #tpu.memory_space<vmem>>, vector<1x512xf32>
    tpu.vector_store %arg2[%c0_35, %c0_36], %113 {strides = array<i32>} : memref<1x512xf32, #tpu.memory_space<vmem>>, vector<1x512xf32>,
    return
  }
  func.func @transform_0(%arg0: i32, %arg1: memref<1xi32, #tpu.memory_space<smem>>) -> (i32, i32) {
    %c0_i32 = arith.constant 0 : i32
    %c0_i32_0 = arith.constant 0 : i32
    return %arg0, %c0_i32 : i32, i32
  }
}

</mosaic_0001>

<bundles_post_ra>
// kernel: tpu_custom_call.1
= control target key start
LH: loop header
LB: loop body
LE: loop exit
PB: predicated region body
PF: predicated region fallthrough
CT: control target
= control target key end

     0   :  { %7 = vsyncpa [#allocation5], 0  ;;  %v1579_v0 = vlaneseq  ;;  %s1004_s26 = smov [#allocation4]   ;;  %s1577_s0 = inlined_call_operand.<no memory space> [shape: s32[1], index: 0, kind: input, shape index: {}]   ;;  %s1578_s1 = inlined_call_operand.hbm [shape: f32[1,512], index: 1, kind: output, shape index: {}]  }
   0x1   :  { %s9_s8 = smul.u32 2654435761, %s1577_s0  ;;  %s920_s27 = sshll.u32 %s1004_s26, 4  ;;  %s921_s27 = int_to_ptr.vmem [resolvable:$true] %s920_s27 }
   0x2   :  { %v22_v1 = vshrl.u32 %v1579_v0, 7  ;;  %v24_v2 = vand.u32 127, %v1579_v0  ;;  %s922_s30 = sshll.u32 %s1578_s1, 4  ;;  %s923_s30 = int_to_ptr.hbm [resolvable:$true] %s922_s30 }
   0x3   :  { %s12_s9 = sxor.u32 1757159915, %s9_s8  ;;  %s102_s10 = sxor.u32 3514319830, %s9_s8 }
   0x4   :  { %s13_s11 = sshrl.u32 %s12_s9, 16  ;;  %s103_s12 = sshrl.u32 %s102_s10, 16  ;;  %v25_v3 = vadd.s32 128, %v24_v2  ;;  %v26_v4 = vadd.s32 256, %v24_v2  ;;  %v27_v5 = vadd.s32 384, %v24_v2  ;;  %v28_v6 = vmul.u32 512, %v22_v1 }
   0x5   :  { %s14_s13 = sxor.u32 %s13_s11, %s12_s9  ;;  %s104_s14 = sxor.u32 %s103_s12, %s102_s10 }
   0x6   :  { %s15_s15 = smul.u32 2146121005, %s14_s13  ;;  %v29_v7 = vadd.s32 %v28_v6, %v24_v2  ;;  %v30_v8 = vadd.s32 %v28_v6, %v25_v3  ;;  %v31_v9 = vadd.s32 %v28_v6, %v26_v4  ;;  %v32_v10 = vadd.s32 %v28_v6, %v27_v5 }
   0x7   :  { %s105_s16 = smul.u32 2146121005, %s104_s14 }
   0x8   :  { %s16_s17 = sshrl.u32 %s15_s15, 15 }
   0x9   :  { %s17_s18 = sxor.u32 %s16_s17, %s15_s15  ;;  %s106_s0 = sshrl.u32 %s105_s16, 15 }
   0xa   :  { %s18_s19 = smul.u32 2221713035, %s17_s18  ;;  %s107_s20 = sxor.u32 %s106_s0, %s105_s16 }
   0xb   :  { %s108_s21 = smul.u32 2221713035, %s107_s20 }
   0xc   :  { %s19_s22 = sshrl.u32 %s18_s19, 16 }
   0xd   :  { %s20_s23 = sxor.u32 %s19_s22, %s18_s19  ;;  %s109_s24 = sshrl.u32 %s108_s21, 16 }
   0xe   :  { %v33_v11 = vstv %s20_s23  ;;  %s110_s25 = sxor.u32 %s109_s24, %s108_s21 }
   0xf   :  { %v34_v12 = vxor.u32 %v33_v11, %v29_v7  ;;  %v35_v13 = vxor.u32 %v33_v11, %v30_v8  ;;  %v36_v14 = vxor.u32 %v33_v11, %v31_v9  ;;  %v37_v15 = vxor.u32 %v33_v11, %v32_v10 }
  0x10   :  { %v111_v16 = vstv %s110_s25 }
  0x11   :  { %v112_v17 = vxor.u32 %v111_v16, %v29_v7  ;;  %v113_v18 = vxor.u32 %v111_v16, %v30_v8  ;;  %v114_v19 = vxor.u32 %v111_v16, %v31_v9  ;;  %v115_v39 = vxor.u32 %v111_v16, %v32_v10 }
  0x12   :  { %v38_v44 = vshrl.u32 %v34_v12, 16  ;;  %v39_v50 = vshrl.u32 %v35_v13, 16  ;;  %v40_v51 = vshrl.u32 %v36_v14, 16  ;;  %v41_v57 = vshrl.u32 %v37_v15, 16 }
  0x13   :  { %v116_v20 = vshrl.u32 %v112_v17, 16  ;;  %v117_v21 = vshrl.u32 %v113_v18, 16  ;;  %v118_v22 = vshrl.u32 %v114_v19, 16  ;;  %v119_v45 = vshrl.u32 %v115_v39, 16 }
  0x14   :  { %v42_v53 = vxor.u32 %v38_v44, %v34_v12  ;;  %v43_v60 = vxor.u32 %v39_v50, %v35_v13  ;;  %v44_v61 = vxor.u32 %v40_v51, %v36_v14  ;;  %v45_v4 = vxor.u32 %v41_v57, %v37_v15 }
  0x15   :  { %v120_v23 = vxor.u32 %v116_v20, %v112_v17  ;;  %v121_v24 = vxor.u32 %v117_v21, %v113_v18  ;;  %v122_v25 = vxor.u32 %v118_v22, %v114_v19  ;;  %v123_v54 = vxor.u32 %v119_v45, %v115_v39 }
  0x16   :  { %v46_v62 = vmul.u32 2146121005, %v42_v53  ;;  %v47_v7 = vmul.u32 2146121005, %v43_v60  ;;  %v48_v8 = vmul.u32 2146121005, %v44_v61 }
  0x17   :  { %v124_v26 = vmul.u32 2146121005, %v120_v23  ;;  %v125_v27 = vmul.u32 2146121005, %v121_v24  ;;  %v126_v28 = vmul.u32 2146121005, %v122_v25 }
  0x18   :  { %v127_v63 = vmul.u32 2146121005, %v123_v54  ;;  %v50_v9 = vshrl.u32 %v46_v62, 15  ;;  %v49_v17 = vmul.u32 2146121005, %v45_v4  ;;  %v51_v19 = vshrl.u32 %v47_v7, 15 }
  0x19   :  { %v128_v29 = vshrl.u32 %v124_v26, 15  ;;  %v129_v30 = vshrl.u32 %v125_v27, 15  ;;  %v130_v31 = vshrl.u32 %v126_v28, 15  ;;  %v52_v13 = vshrl.u32 %v48_v8, 15 }
  0x1a   :  { %v131_v10 = vshrl.u32 %v127_v63, 15  ;;  %v54_v14 = vxor.u32 %v50_v9, %v46_v62  ;;  %v53_v24 = vshrl.u32 %v49_v17, 15  ;;  %v55_v25 = vxor.u32 %v51_v19, %v47_v7 }
  0x1b   :  { %v132_v32 = vxor.u32 %v128_v29, %v124_v26  ;;  %v133_v33 = vxor.u32 %v129_v30, %v125_v27  ;;  %v134_v35 = vxor.u32 %v130_v31, %v126_v28  ;;  %v56_v26 = vxor.u32 %v52_v13, %v48_v8 }
  0x1c   :  { %v135_v20 = vxor.u32 %v131_v10, %v127_v63  ;;  %v58_v27 = vmul.u32 2221713035, %v54_v14  ;;  %v997_v19 = vmov 683565275   ;;  %v998_v14 = vmov 2475754826  }
  0x1d   :  { %v136_v34 = vmul.u32 2221713035, %v132_v32  ;;  %v137_v36 = vmul.u32 2221713035, %v133_v33  ;;  %v138_v41 = vmul.u32 2221713035, %v134_v35  ;;  %v57_v32 = vxor.u32 %v53_v24, %v49_v17 }
  0x1e   :  { %v139_v28 = vmul.u32 2221713035, %v135_v20  ;;  %v60_v35 = vmul.u32 2221713035, %v56_v26 }
  0x1f   :  { %v140_v37 = vshrl.u32 %v136_v34, 16  ;;  %v141_v38 = vshrl.u32 %v137_v36, 16  ;;  %v142_v47 = vshrl.u32 %v138_v41, 16 }
  0x21   :  { %v144_v40 = vxor.u32 %v140_v37, %v136_v34  ;;  %v145_v42 = vxor.u32 %v141_v38, %v137_v36  ;;  %v146_v56 = vxor.u32 %v142_v47, %v138_v41  ;;  %v59_v34 = vmul.u32 2221713035, %v55_v25 }
  0x22   :  { %v62_v36 = vshrl.u32 %v58_v27, 16  ;;  %v143_v37 = vshrl.u32 %v139_v28, 16  ;;  %v61_v41 = vmul.u32 2221713035, %v57_v32  ;;  %v1000_v25 = vmov 2102212464  }
  0x23   :  { %v148_v43 = vshrl.u32 %v144_v40, 16  ;;  %v149_v46 = vshrl.u32 %v145_v42, 16  ;;  %v150_v3 = vshrl.u32 %v146_v56, 16 }
  0x24   :  { %v66_v44 = vxor.u32 %v62_v36, %v58_v27  ;;  %v147_v45 = vxor.u32 %v143_v37, %v139_v28 }
  0x25   :  { %v152_v48 = vxor.u32 %v148_v43, %v144_v40  ;;  %v153_v49 = vxor.u32 %v149_v46, %v145_v42  ;;  %v154_v12 = vxor.u32 %v150_v3, %v146_v56  ;;  %v63_v42 = vshrl.u32 %v59_v34, 16 }
  0x26   :  { %v64_v43 = vshrl.u32 %v60_v35, 16  ;;  %v151_v53 = vshrl.u32 %v147_v45, 16 }
  0x27   :  { %v156_v52 = vmul.u32 2146121005, %v152_v48  ;;  %v157_v55 = vmul.u32 2146121005, %v153_v49  ;;  %v158_v22 = vmul.u32 2146121005, %v154_v12  ;;  %v67_v50 = vxor.u32 %v63_v42, %v59_v34 }
  0x28   :  { %v65_v49 = vshrl.u32 %v61_v41, 16  ;;  %v68_v51 = vxor.u32 %v64_v43, %v60_v35  ;;  %v1028_v63 = vxor.u32 %v151_v53, %v147_v45 }
  0x29   :  { %v160_v58 = vshrl.u32 %v156_v52, 15  ;;  %v161_v59 = vshrl.u32 %v157_v55, 15  ;;  %v162_v30 = vshrl.u32 %v158_v22, 15  ;;  %v71_v60 = vshrl.u32 %v67_v50, 16 }
  0x2a   :  { %v69_v57 = vxor.u32 %v65_v49, %v61_v41  ;;  %v72_v61 = vshrl.u32 %v68_v51, 16  ;;  %v159_v10 = vmul.u32 2146121005, %v1028_v63 }
  0x2b   :  { %v164_v1 = vxor.u32 %v160_v58, %v156_v52  ;;  %v165_v2 = vxor.u32 %v161_v59, %v157_v55  ;;  %v166_v39 = vxor.u32 %v162_v30, %v158_v22  ;;  %v70_v52 = vshrl.u32 %v66_v44, 16 }
  0x2c   :  { %v73_v4 = vshrl.u32 %v69_v57, 16  ;;  %v1033_v7 = vxor.u32 %v71_v60, %v67_v50  ;;  %v1035_v8 = vxor.u32 %v72_v61, %v68_v51  ;;  %v999_v22 = vmov 2131351028  }
  0x2d   :  { %v168_v5 = vmul.u32 2221713035, %v164_v1  ;;  %v169_v6 = vmul.u32 2221713035, %v165_v2  ;;  %v170_v47 = vmul.u32 2221713035, %v166_v39  ;;  %v1026_v62 = vxor.u32 %v70_v52, %v66_v44 }
  0x2e   :  { %v1039_v17 = vxor.u32 %v73_v4, %v69_v57  ;;  %v1001_v30 = vmov 920167782   ;;  %v79_v36 = vmul.u32 2146121005, %v1033_v7  ;;  %v1002_v39 = vmov 1326507024  }
  0x2f   :  { %v172_v11 = vshrl.u32 %v168_v5, 16  ;;  %v173_v16 = vshrl.u32 %v169_v6, 16  ;;  %v174_v55 = vshrl.u32 %v170_v47, 16  ;;  %v78_v9 = vmul.u32 2146121005, %v1026_v62 }
  0x30   :  { %v163_v44 = vshrl.u32 %v159_v10, 15 }
  0x31   :  { %v176_v18 = vxor.u32 %v172_v11, %v168_v5  ;;  %v177_v23 = vxor.u32 %v173_v16, %v169_v6  ;;  %v178_v1 = vxor.u32 %v174_v55, %v170_v47 }
  0x32   :  { %v1062_v63 = vxor.u32 %v163_v44, %v159_v10  ;;  %v1003_v44 = vmov 0  }
  0x33   :  { %v192_v21 = vshrl.u32 %v176_v18, 9  ;;  %v193_v31 = vshrl.u32 %v177_v23, 9  ;;  %v194_v12 = vshrl.u32 %v178_v1, 9 }
  0x35   :  { %v196_v15 = vor.u32 1065353216, %v192_v21  ;;  %v197_v40 = vor.u32 1065353216, %v193_v31  ;;  %v198_v28 = vor.u32 1065353216, %v194_v12 }
  0x37   :  { %v931_v29 = vadd.f32 -1.0, %v196_v15  ;;  %v932_v48 = vadd.f32 -1.0, %v197_v40  ;;  %v933_v45 = vadd.f32 -1.0, %v198_v28 }
  0x39   :  { %v1020_v33 = vmul.f32 6.2831855, %v931_v29  ;;  %v1023_v56 = vmul.f32 6.2831855, %v932_v48  ;;  %v1066_v12 = vmul.f32 6.2831855, %v933_v45 }
  0x3b   :  { %v279_v38 = vand.u32 2139095040, %v1020_v33  ;;  %v276_v58 = vand.u32 2147483647, %v1020_v33  ;;  %v433_v3 = vand.u32 2139095040, %v1023_v56  ;;  %v430_v35 = vand.u32 2147483647, %v1023_v56 }
  0x3c   :  { %v1581_v7 = vand.u32 2147483647, %v1066_v12 }
  0x3d   :  { %v280_v46 = vshrl.u32 %v279_v38, 23  ;;  %v283_v5 = vand.u32 8388607, %v276_v58  ;;  %v434_v16 = vshrl.u32 %v433_v3, 23  ;;  %v1059_v49 = vand.u32 8388607, %v430_v35 }
  0x3f   :  { %v935_v54 = vadd.s32 4294967169, %v280_v46  ;;  %v284_v18 = vor.u32 8388608, %v283_v5  ;;  %v938_v29 = vadd.s32 4294967169, %v434_v16 }
  0x41   :  { %v286_v59 = vadd.s32 1, %v935_v54  ;;  %v1050_v34 = vshll.u32 %v284_v18, 8  ;;  %v440_v47 = vadd.s32 1, %v938_v29  ;;  %v438_v18 = vor.u32 8388608, %v1059_v49 }
  0x43   :  { %vm287_vm0 = vcmp.gt.s32.totalorder %v286_v59, 0  ;;  %v325_v48 = vand.u32 65535, %v1050_v34  ;;  %v326_v52 = vshrl.u32 %v1050_v34, 16  ;;  %vm441_vm5 = vcmp.gt.s32.totalorder %v440_v47, 0 }
  0x44   :  { %v288_v2 = vsel %vm287_vm0, %v286_v59, 0  ;;  %v442_v3 = vsel %vm441_vm5, %v440_v47, 0 }
  0x45   :  { %v290_v6 = vand.u32 31, %v288_v2  ;;  %v289_v24 = vshrl.u32 %v288_v2, 5 }
  0x47   :  { %v291_v11 = vsub.s32 32, %v290_v6  ;;  %v293_v13 = vshll.u32 %v997_v19, %v290_v6  ;;  %v296_v21 = vshll.u32 %v998_v14, %v290_v6  ;;  %v299_v15 = vshll.u32 %v999_v22, %v290_v6 }
  0x48   :  { %v302_v27 = vshll.u32 %v1000_v25, %v290_v6  ;;  %v305_v32 = vshll.u32 %v1001_v30, %v290_v6  ;;  %vm308_vm1 = vcmp.lt.s32.totalorder %v289_v24, 1  ;;  %vm310_vm2 = vcmp.lt.s32.totalorder %v289_v24, 3 }
  0x49   :  { %v294_v20 = vshrl.u32 %v998_v14, %v291_v11  ;;  %v297_v23 = vshrl.u32 %v999_v22, %v291_v11  ;;  %v300_v26 = vshrl.u32 %v1000_v25, %v291_v11  ;;  %v303_v31 = vshrl.u32 %v1001_v30, %v291_v11 }
  0x4a   :  { %v306_v40 = vshrl.u32 %v1002_v39, %v291_v11  ;;  %v292_v41 = vshrl.u32 %v997_v19, %v291_v11  ;;  %vm311_vm3 = vcmp.lt.s32.totalorder %v289_v24, 4  ;;  %vm309_vm4 = vcmp.lt.s32.totalorder %v289_v24, 2 }
  0x4b   :  { %v295_v37 = vor.u32 %v294_v20, %v293_v13  ;;  %v298_v38 = vor.u32 %v297_v23, %v296_v21  ;;  %v301_v42 = vor.u32 %v300_v26, %v299_v15  ;;  %v304_v43 = vor.u32 %v303_v31, %v302_v27 }
  0x4c   :  { %v307_v46 = vor.u32 %v306_v40, %v305_v32  ;;  %v444_v21 = vand.u32 31, %v442_v3  ;;  %v1072_v27 = vshrl.u32 %v442_v3, 5 }
  0x4d   :  { %v313_v50 = vsel %vm311_vm3, %v301_v42, 2102212464  ;;  %v316_v51 = vsel %vm308_vm1, %v295_v37, %v298_v38  ;;  %v312_v53 = vsel %vm308_vm1, %v292_v41, %v295_v37  ;;  %v317_v54 = vsel %vm311_vm3, %v304_v43, 920167782 }
  0x4e   :  { %v320_v55 = vsel %vm308_vm1, %v298_v38, %v301_v42  ;;  %v321_v57 = vsel %vm311_vm3, %v307_v46, 1326507024  ;;  %v314_v59 = vsel %vm310_vm2, %v298_v38, %v313_v50  ;;  %v318_v60 = vsel %vm310_vm2, %v301_v42, %v317_v54 }
  0x4f   :  { %v322_v61 = vsel %vm310_vm2, %v304_v43, %v321_v57  ;;  %v319_v1 = vsel %vm309_vm4, %v316_v51, %v318_v60  ;;  %v1069_v16 = vsel %vm309_vm4, %v312_v53, %v314_v59  ;;  %v445_v43 = vsub.s32 32, %v444_v21 }
  0x50   :  { %v323_v2 = vsel %vm309_vm4, %v320_v55, %v322_v61  ;;  %v349_v6 = vand.u32 65535, %v319_v1  ;;  %v350_v11 = vshrl.u32 %v319_v1, 16  ;;  %v447_v50 = vshll.u32 %v997_v19, %v444_v21 }
  0x51   :  { %v327_v4 = vand.u32 65535, %v323_v2  ;;  %v328_v5 = vshrl.u32 %v323_v2, 16  ;;  %v450_v53 = vshll.u32 %v998_v14, %v444_v21  ;;  %v448_v57 = vshrl.u32 %v998_v14, %v445_v43 }
  0x52   :  { %v351_v23 = vmul.u32 %v349_v6, %v325_v48  ;;  %v352_v15 = vmul.u32 %v350_v11, %v325_v48  ;;  %v353_v26 = vmul.u32 %v349_v6, %v326_v52  ;;  %v354_v32 = vmul.u32 %v350_v11, %v326_v52 }
  0x53   :  { %v329_v13 = vmul.u32 %v327_v4, %v325_v48  ;;  %v330_v20 = vmul.u32 %v328_v5, %v325_v48  ;;  %v331_v10 = vmul.u32 %v327_v4, %v326_v52  ;;  %v332_v28 = vmul.u32 %v328_v5, %v326_v52 }
  0x54   :  { %v355_v24 = vshll.u32 %v352_v15, 16  ;;  %v357_v40 = vshll.u32 %v353_v26, 16  ;;  %v356_v42 = vshrl.u32 %v352_v15, 16  ;;  %v358_v46 = vshrl.u32 %v353_v26, 16 }
  0x55   :  { %v333_v29 = vshll.u32 %v330_v20, 16  ;;  %v335_v31 = vshll.u32 %v331_v10, 16  ;;  %v334_v37 = vshrl.u32 %v330_v20, 16  ;;  %v336_v38 = vshrl.u32 %v331_v10, 16 }
  0x56   :  { %vm359_vm7 = vc.u32 %v351_v23, %v355_v24  ;;  %v361_v47 = vadd.s32 %v355_v24, %v351_v23  ;;  %v451_v59 = vshrl.u32 %v999_v22, %v445_v43  ;;  %v453_v61 = vshll.u32 %v999_v22, %v444_v21 }
  0x57   :  { %vm337_vm6 = vc.u32 %v329_v13, %v333_v29  ;;  %v339_v41 = vadd.s32 %v333_v29, %v329_v13  ;;  %v360_v49 = vsel %vm359_vm7, 1, %v1003_v44  ;;  %v454_v1 = vshrl.u32 %v1000_v25, %v445_v43 }
  0x58   :  { %v338_v45 = vsel %vm337_vm6, 1, %v1003_v44  ;;  %v362_v52 = vadd.s32 %v360_v49, %v354_v32  ;;  %vm363_vm9 = vc.u32 %v361_v47, %v357_v40  ;;  %v456_v2 = vshll.u32 %v1000_v25, %v444_v21 }
  0x59   :  { %v340_v48 = vadd.s32 %v338_v45, %v332_v28  ;;  %vm341_vm8 = vc.u32 %v339_v41, %v335_v31  ;;  %v364_v55 = vsel %vm363_vm9, 1, %v1003_v44  ;;  %v1085_v4 = vadd.s32 %v361_v47, %v357_v40 }
  0x5a   :  { %v342_v51 = vsel %vm341_vm8, 1, %v1003_v44  ;;  %v366_v60 = vadd.s32 %v364_v55, %v362_v52  ;;  %v449_v5 = vor.u32 %v448_v57, %v447_v50  ;;  %v457_v6 = vshrl.u32 %v1001_v30, %v445_v43 }
  0x5b   :  { %v344_v54 = vadd.s32 %v342_v51, %v340_v48  ;;  %v452_v13 = vor.u32 %v451_v59, %v450_v53  ;;  %v459_v20 = vshll.u32 %v1001_v30, %v444_v21  ;;  %v460_v10 = vshrl.u32 %v1002_v39, %v445_v43 }
  0x5c   :  { %v367_v11 = vadd.s32 %v366_v60, %v356_v42  ;;  %v455_v15 = vor.u32 %v454_v1, %v453_v61  ;;  %v458_v26 = vor.u32 %v457_v6, %v456_v2  ;;  %vm462_vm10 = vcmp.lt.s32.totalorder %v1072_v27, 1 }
  0x5d   :  { %v345_v3 = vadd.s32 %v344_v54, %v334_v37  ;;  %v461_v29 = vor.u32 %v460_v10, %v459_v20  ;;  %vm464_vm11 = vcmp.lt.s32.totalorder %v1072_v27, 3  ;;  %vm465_vm12 = vcmp.lt.s32.totalorder %v1072_v27, 4 }
  0x5e   :  { %v368_v28 = vadd.s32 %v367_v11, %v358_v46  ;;  %v369_v31 = vmul.u32 %v1050_v34, %v1069_v16  ;;  %vm463_vm14 = vcmp.lt.s32.totalorder %v1072_v27, 2  ;;  %v1100_v21 = vshll.u32 %v438_v18, 8 }
  0x5f   :  { %v1090_v23 = vadd.s32 %v345_v3, %v336_v38  ;;  %v80_v32 = vmul.u32 2146121005, %v1035_v8  ;;  %v470_v38 = vsel %vm462_vm10, %v449_v5, %v452_v13  ;;  %v471_v24 = vsel %vm465_vm12, %v458_v26, 920167782 }
  0x60   :  { %v372_v37 = vadd.s32 1, %v368_v28  ;;  %v81_v40 = vmul.u32 2146121005, %v1039_v17  ;;  %v472_v34 = vsel %vm464_vm11, %v455_v15, %v471_v24  ;;  %v474_v16 = vsel %vm462_vm10, %v452_v13, %v455_v15 }
  0x61   :  { %vm371_vm13 = vc.u32 %v1090_v23, %v1085_v4  ;;  %v587_v18 = vand.u32 2139095040, %v1066_v12  ;;  %v171_v41 = vmul.u32 2221713035, %v1062_v63  ;;  %v473_v45 = vsel %vm463_vm14, %v470_v38, %v472_v34 }
  0x62   :  { %v373_v42 = vsel %vm371_vm13, %v372_v37, %v368_v28  ;;  %v475_v46 = vsel %vm465_vm12, %v461_v29, 1326507024  ;;  %v479_v49 = vand.u32 65535, %v1100_v21  ;;  %v480_v50 = vshrl.u32 %v1100_v21, 16 }
  0x63   :  { %v374_v47 = vadd.s32 %v373_v42, %v369_v31  ;;  %v476_v48 = vsel %vm464_vm11, %v458_v26, %v475_v46  ;;  %v446_v51 = vshrl.u32 %v997_v19, %v445_v43  ;;  %v503_v53 = vand.u32 65535, %v473_v45 }
  0x64   :  { %v477_v52 = vsel %vm463_vm14, %v474_v16, %v476_v48  ;;  %v504_v54 = vshrl.u32 %v473_v45, 16  ;;  %v588_v60 = vshrl.u32 %v587_v18, 23  ;;  %v467_v61 = vsel %vm465_vm12, %v455_v15, 2102212464 }
  0x65   :  { %v375_v55 = vadd.s32 536870912, %v374_v47  ;;  %v481_v57 = vand.u32 65535, %v477_v52  ;;  %v482_v59 = vshrl.u32 %v477_v52, 16  ;;  %v505_v1 = vmul.u32 %v503_v53, %v479_v49 }
  0x66   :  { %v506_v2 = vmul.u32 %v504_v54, %v479_v49  ;;  %v507_v3 = vmul.u32 %v503_v53, %v480_v50  ;;  %v82_v10 = vshrl.u32 %v78_v9, 15  ;;  %v175_v26 = vshrl.u32 %v171_v41, 16 }
  0x67   :  { %v1127_v6 = vshrl.u32 %v375_v55, 30  ;;  %v483_v11 = vmul.u32 %v481_v57, %v479_v49  ;;  %v484_v20 = vmul.u32 %v482_v59, %v479_v49  ;;  %v485_v43 = vmul.u32 %v481_v57, %v480_v50 }
  0x68   :  { %v466_v28 = vsel %vm462_vm10, %v446_v51, %v449_v5  ;;  %v509_v29 = vshll.u32 %v506_v2, 16  ;;  %v468_v31 = vsel %vm464_vm11, %v452_v13, %v467_v61  ;;  %v486_v37 = vmul.u32 %v482_v59, %v480_v50 }
  0x69   :  { %v377_v15 = vshll.u32 %v1127_v6, 30  ;;  %v487_v38 = vshll.u32 %v484_v20, 16  ;;  %v489_v24 = vshll.u32 %v485_v43, 16  ;;  %v508_v34 = vmul.u32 %v504_v54, %v480_v50 }
  0x6a   :  { %v511_v16 = vshll.u32 %v507_v3, 16  ;;  %vm513_vm15 = vc.u32 %v505_v1, %v509_v29  ;;  %v941_v45 = vadd.s32 4294967169, %v588_v60  ;;  %v488_v46 = vshrl.u32 %v484_v20, 16 }
  0x6b   :  { %v1138_v18 = vsub.s32 %v374_v47, %v377_v15  ;;  %vm491_vm0 = vc.u32 %v483_v11, %v487_v38  ;;  %v493_v42 = vadd.s32 %v487_v38, %v483_v11  ;;  %v514_v48 = vsel %vm513_vm15, 1, %v1003_v44 }
  0x6c   :  { %v492_v5 = vsel %vm491_vm0, 1, %v1003_v44  ;;  %v515_v49 = vadd.s32 %v509_v29, %v505_v1  ;;  %v510_v52 = vshrl.u32 %v506_v2, 16  ;;  %v516_v47 = vadd.s32 %v514_v48, %v508_v34 }
  0x6d   :  { %vm379_vm1 = vcmp.lt.s32.totalorder %v1138_v18, 0  ;;  %v380_v13 = vsub.s32 0, %v1138_v18  ;;  %v494_v51 = vadd.s32 %v492_v5, %v486_v37  ;;  %vm495_vm2 = vc.u32 %v493_v42, %v489_v24 }
  0x6e   :  { %v496_v50 = vsel %vm495_vm2, 1, %v1003_v44  ;;  %vm517_vm3 = vc.u32 %v515_v49, %v511_v16  ;;  %v490_v54 = vshrl.u32 %v485_v43, 16  ;;  %v512_v60 = vshrl.u32 %v507_v3, 16 }
  0x6f   :  { %v381_v53 = vsel %vm379_vm1, %v380_v13, %v1138_v18  ;;  %v498_v55 = vadd.s32 %v496_v50, %v494_v51  ;;  %v518_v57 = vsel %vm517_vm3, 1, %v1003_v44  ;;  %v594_v1 = vadd.s32 1, %v941_v45 }
  0x70   :  { %v382_v59 = vclz %v381_v53  ;;  %v520_v61 = vadd.s32 %v518_v57, %v516_v47  ;;  %v83_v11 = vshrl.u32 %v79_v36, 15  ;;  %v84_v20 = vshrl.u32 %v80_v32, 15 }
  0x71   :  { %v85_v2 = vshrl.u32 %v81_v40, 15  ;;  %v499_v29 = vadd.s32 %v498_v55, %v488_v46  ;;  %v86_v43 = vxor.u32 %v82_v10, %v78_v9  ;;  %v1155_v15 = vadd.s32 %v515_v49, %v511_v16 }
  0x72   :  { %v521_v37 = vadd.s32 %v520_v61, %v510_v52  ;;  %vm595_vm4 = vcmp.gt.s32.totalorder %v594_v1, 0  ;;  %v936_v3 = vadd.s32 4294967294, %v382_v59  ;;  %v469_v38 = vsel %vm463_vm14, %v466_v28, %v468_v31 }
  0x73   :  { %v1159_v24 = vadd.s32 %v499_v29, %v490_v54  ;;  %v179_v34 = vxor.u32 %v175_v26, %v171_v41  ;;  %v596_v45 = vsel %vm595_vm4, %v594_v1, 0  ;;  %v1165_v46 = vxor.u32 %v83_v11, %v79_v36 }
  0x74   :  { %v522_v42 = vadd.s32 %v521_v37, %v512_v60  ;;  %v1169_v62 = vxor.u32 %v84_v20, %v80_v32  ;;  %v1173_v9 = vxor.u32 %v85_v2, %v81_v40  ;;  %v90_v27 = vmul.u32 2221713035, %v86_v43 }
  0x75   :  { %v523_v10 = vmul.u32 %v1100_v21, %v469_v38  ;;  %vm525_vm5 = vc.u32 %v1159_v24, %v1155_v15  ;;  %vm937_vm6 = vcmp.lt.s32.totalorder %v936_v3, 0  ;;  %v598_v36 = vand.u32 31, %v596_v45 }
  0x76   :  { %v526_v63 = vadd.s32 1, %v522_v42  ;;  %v195_v41 = vshrl.u32 %v179_v34, 9  ;;  %v91_v8 = vmul.u32 2221713035, %v1165_v46  ;;  %v92_v17 = vmul.u32 2221713035, %v1169_v62 }
  0x77   :  { %v1180_v26 = vsub.s32 32, %v598_v36  ;;  %v93_v40 = vmul.u32 2221713035, %v1173_v9  ;;  %v1184_v28 = vsel %vm937_vm6, 0, %v936_v3  ;;  %v94_v31 = vshrl.u32 %v90_v27, 16 }
  0x78   :  { %v527_v32 = vsel %vm525_vm5, %v526_v63, %v522_v42  ;;  %v591_v16 = vand.u32 8388607, %v1581_v7  ;;  %v604_v5 = vshll.u32 %v998_v14, %v598_v36  ;;  %v199_v49 = vor.u32 1065353216, %v195_v41 }
  0x79   :  { %v528_v21 = vadd.s32 %v527_v32, %v523_v10  ;;  %v605_v48 = vshrl.u32 %v999_v22, %v1180_v26  ;;  %v1191_v51 = vshrl.u32 %v596_v45, 5  ;;  %v607_v50 = vshll.u32 %v999_v22, %v598_v36 }
  0x7a   :  { %v390_v52 = vsub.s32 4294967266, %v1184_v28  ;;  %v601_v47 = vshll.u32 %v997_v19, %v598_v36  ;;  %v608_v53 = vshrl.u32 %v1000_v25, %v1180_v26  ;;  %v610_v54 = vshll.u32 %v1000_v25, %v598_v36 }
  0x7b   :  { %v529_v13 = vadd.s32 536870912, %v528_v21  ;;  %v602_v57 = vshrl.u32 %v998_v14, %v1180_v26  ;;  %v611_v59 = vshrl.u32 %v1001_v30, %v1180_v26  ;;  %v613_v60 = vshll.u32 %v1001_v30, %v598_v36 }
  0x7c   :  { %v370_v61 = vadd.s32 %v1085_v4, %v1090_v23  ;;  %v592_v1 = vor.u32 8388608, %v591_v16  ;;  %v1208_v11 = vor.u32 %v605_v48, %v604_v5  ;;  %v614_v20 = vshrl.u32 %v1002_v39, %v1180_v26 }
  0x7d   :  { %v1199_v55 = vshrl.u32 %v529_v13, 30  ;;  %v1213_v29 = vor.u32 %v608_v53, %v607_v50  ;;  %v612_v43 = vor.u32 %v611_v59, %v610_v54  ;;  %vm619_vm7 = vcmp.lt.s32.totalorder %v1191_v51, 4 }
  0x7e   :  { %v386_v37 = vsub.s32 32, %v1184_v28  ;;  %v391_v3 = vadd.s32 127, %v390_v52  ;;  %v615_v38 = vor.u32 %v614_v20, %v613_v60  ;;  %vm616_vm8 = vcmp.lt.s32.totalorder %v1191_v51, 1 }
  0x7f   :  { %v531_v2 = vshll.u32 %v1199_v55, 30  ;;  %v95_v4 = vshrl.u32 %v91_v8, 16  ;;  %v98_v23 = vxor.u32 %v94_v31, %v90_v27  ;;  %v1220_v42 = vor.u32 %v602_v57, %v601_v47 }
  0x80   :  { %v934_v45 = vadd.f32 -1.0, %v199_v49  ;;  %vm618_vm9 = vcmp.lt.s32.totalorder %v1191_v51, 3  ;;  %v625_v10 = vsel %vm619_vm7, %v612_v43, 920167782  ;;  %v1225_v63 = vshll.u32 %v592_v1, 8 }
  0x81   :  { %v532_v34 = vsub.s32 %v528_v21, %v531_v2  ;;  %vm617_vm11 = vcmp.lt.s32.totalorder %v1191_v51, 2  ;;  %v628_v27 = vsel %vm616_vm8, %v1208_v11, %v1213_v29  ;;  %v387_v41 = vshll.u32 %v1138_v18, %v1184_v28 }
  0x82   :  { %v388_v32 = vshrl.u32 %v370_v61, %v386_v37  ;;  %v392_v21 = vshll.u32 %v391_v3, 23  ;;  %v629_v31 = vsel %vm619_vm7, %v615_v38, 1326507024  ;;  %v624_v5 = vsel %vm616_vm8, %v1220_v42, %v1208_v11 }
  0x83   :  { %vm533_vm10 = vcmp.lt.s32.totalorder %v532_v34, 0  ;;  %v534_v36 = vsub.s32 0, %v532_v34  ;;  %v626_v48 = vsel %vm618_vm9, %v1213_v29, %v625_v10  ;;  %v630_v49 = vsel %vm618_vm9, %v612_v43, %v629_v31 }
  0x84   :  { %v180_v13 = vshrl.u32 %v98_v23, 9  ;;  %v631_v28 = vsel %vm617_vm11, %v628_v27, %v630_v49  ;;  %v633_v50 = vand.u32 65535, %v1225_v63  ;;  %v634_v52 = vshrl.u32 %v1225_v63, 16 }
  0x85   :  { %v535_v16 = vsel %vm533_vm10, %v534_v36, %v532_v34  ;;  %v635_v47 = vand.u32 65535, %v631_v28  ;;  %v636_v53 = vshrl.u32 %v631_v28, 16  ;;  %v1251_v54 = vshrl.u32 %v92_v17, 16 }
  0x86   :  { %v536_v18 = vclz %v535_v16  ;;  %v1255_v57 = vshrl.u32 %v93_v40, 16  ;;  %v627_v60 = vsel %vm617_vm11, %v624_v5, %v626_v48  ;;  %v99_v61 = vxor.u32 %v95_v4, %v91_v8 }
  0x87   :  { %v1261_v1 = vmul.f32 6.2831855, %v934_v45  ;;  %v389_v20 = vor.u32 %v388_v32, %v387_v41  ;;  %v393_v2 = vor.u32 4788187, %v392_v21  ;;  %v184_v43 = vor.u32 1065353216, %v180_v13 }
  0x88   :  { %v939_v59 = vadd.s32 4294967294, %v536_v18  ;;  %v524_v37 = vadd.s32 %v1155_v15, %v1159_v24  ;;  %v638_v3 = vmul.u32 %v636_v53, %v633_v50  ;;  %v1265_v23 = vmul.u32 %v635_v47, %v634_v52 }
  0x89   :  { %v657_v10 = vand.u32 65535, %v627_v60  ;;  %v658_v36 = vshrl.u32 %v627_v60, 16  ;;  %v637_v46 = vmul.u32 %v635_v47, %v633_v50  ;;  %v181_v8 = vshrl.u32 %v99_v61, 9 }
  0x8a   :  { %vm940_vm12 = vcmp.lt.s32.totalorder %v939_v59, 0  ;;  %v394_v4 = vand.u32 2147483647, %v393_v2  ;;  %v396_v45 = vcvt.s32.f32 %v389_v20  ;;  %v741_v41 = vand.u32 2139095040, %v1261_v1 }
  0x8b   :  { %v539_v38 = vsel %vm940_vm12, 0, %v939_v59  ;;  %v640_v5 = vmul.u32 %v636_v53, %v634_v52  ;;  %v641_v15 = vshll.u32 %v638_v3, 16  ;;  %v204_v24 = vsub.f32 2.0, %v184_v43 }
  0x8c   :  { %v540_v27 = vsub.s32 32, %v539_v38  ;;  %v541_v31 = vshll.u32 %v532_v34, %v539_v38  ;;  %v544_v16 = vsub.s32 4294967266, %v539_v38  ;;  %v643_v48 = vshll.u32 %v1265_v23, 16 }
  0x8d   :  { %v660_v49 = vmul.u32 %v658_v36, %v633_v50  ;;  %v661_v13 = vmul.u32 %v657_v10, %v634_v52  ;;  %vm645_vm13 = vc.u32 %v637_v46, %v641_v15  ;;  %v647_v34 = vadd.s32 %v641_v15, %v637_v46 }
  0x8e   :  { %v542_v32 = vshrl.u32 %v524_v37, %v540_v27  ;;  %v545_v21 = vadd.s32 127, %v544_v16  ;;  %v600_v47 = vshrl.u32 %v997_v19, %v1180_v26  ;;  %v646_v59 = vsel %vm645_vm13, 1, %v1003_v44 }
  0x8f   :  { %v659_v60 = vmul.u32 %v657_v10, %v633_v50  ;;  %v742_v61 = vshrl.u32 %v741_v41, 23  ;;  %v397_v20 = vmul.f32 %v396_v45, %v394_v4  ;;  %v648_v53 = vadd.s32 %v646_v59, %v640_v5 }
  0x90   :  { %v543_v18 = vor.u32 %v542_v32, %v541_v31  ;;  %v546_v28 = vshll.u32 %v545_v21, 23  ;;  %vm649_vm14 = vc.u32 %v647_v34, %v643_v48  ;;  %v642_v43 = vshrl.u32 %v638_v3, 16 }
  0x91   :  { %v650_v37 = vsel %vm649_vm14, 1, %v1003_v44  ;;  %v662_v38 = vmul.u32 %v658_v36, %v634_v52  ;;  %v663_v27 = vshll.u32 %v660_v49, 16  ;;  %v665_v46 = vshll.u32 %v661_v13, 16 }
  0x92   :  { %v547_v2 = vor.u32 4788187, %v546_v28  ;;  %v550_v16 = vcvt.s32.f32 %v543_v18  ;;  %v652_v32 = vadd.s32 %v650_v37, %v648_v53  ;;  %v185_v21 = vor.u32 1065353216, %v181_v8 }
  0x93   :  { %955 = vlog2.f32 %v204_v24  ;;  %v621_v26 = vsel %vm619_vm7, %v1213_v29, 2102212464  ;;  %vm667_vm15 = vc.u32 %v659_v60, %v663_v27  ;;  %v398_v50 = vxor.u32 2147483648, %v397_v20 }
  0x94   :  { %v548_v31 = vand.u32 2147483647, %v547_v2  ;;  %v620_v3 = vsel %vm616_vm8, %v600_v47, %v1220_v42  ;;  %v668_v10 = vsel %vm667_vm15, 1, %v1003_v44  ;;  %v669_v52 = vadd.s32 %v663_v27, %v659_v60 }
  0x95   :  { %v644_v36 = vshrl.u32 %v1265_v23, 16  ;;  %v653_v4 = vadd.s32 %v652_v32, %v642_v43  ;;  %v670_v45 = vadd.s32 %v668_v10, %v662_v38  ;;  %v944_v41 = vadd.s32 4294967169, %v742_v61 }
  0x96   :  { %v551_v8 = vmul.f32 %v550_v16, %v548_v31  ;;  %v622_v5 = vsel %vm618_vm9, %v1208_v11, %v621_v26  ;;  %v664_v29 = vshrl.u32 %v660_v49, 16  ;;  %vm671_vm0 = vc.u32 %v669_v52, %v665_v46 }
  0x97   :  { %v100_v15 = vxor.u32 %v1251_v54, %v92_v17  ;;  %v101_v42 = vxor.u32 %v1255_v57, %v93_v40  ;;  %vm278_vm1 = vcmp.lt.s32.totalorder %v1020_v33, 0  ;;  %v672_v23 = vsel %vm671_vm0, 1, %v1003_v44 }
  0x98   :  { %v205_v24 = vsub.f32 2.0, %v185_v21  ;;  %v666_v48 = vshrl.u32 %v661_v13, 16  ;;  %v674_v18 = vadd.s32 %v672_v23, %v670_v45  ;;  %v748_v28 = vadd.s32 1, %v944_v41 }
  0x99   :  { %v956_v34 = vpop.eup %955  ;;  %vm1294_vm2 = vcmp.le.f32.partialorder %v276_v58, 0.7853982  ;;  %v623_v62 = vsel %vm617_vm11, %v620_v3, %v622_v5  ;;  %v1300_v9 = vadd.s32 %v653_v4, %v644_v36  ;;  %v1302_v17 = vadd.s32 %v669_v52, %v665_v46 }
  0x9a   :  { %v399_v40 = vsel %vm278_vm1, %v398_v50, %v397_v20  ;;  %v552_v54 = vxor.u32 2147483648, %v551_v8  ;;  %v675_v57 = vadd.s32 %v674_v18, %v664_v29  ;;  %vm749_vm3 = vcmp.gt.s32.totalorder %v748_v28, 0 }
  0x9b   :  { %v182_v49 = vshrl.u32 %v100_v15, 9  ;;  %v183_v13 = vshrl.u32 %v101_v42, 9  ;;  %vm432_vm4 = vcmp.lt.s32.totalorder %v1023_v56, 0  ;;  %v750_v58 = vsel %vm749_vm3, %v748_v28, 0 }
  0x9c   :  { %v213_v47 = vmul.f32 0.6931472, %v956_v34  ;;  %957 = vlog2.f32 %v205_v24  ;;  %v676_v59 = vadd.s32 %v675_v57, %v666_v48  ;;  %v1580_v51 = vand.u32 2147483647, %v1261_v1 }
  0x9d   :  { %v1311_v60 = vsel %vm1294_vm2, %v1020_v33, %v399_v40  ;;  %v677_v61 = vmul.u32 %v1225_v63, %v623_v62  ;;  %vm679_vm5 = vc.u32 %v1300_v9, %v1302_v17  ;;  %v752_v20 = vand.u32 31, %v750_v58 }
  0x9e   :  { %vm1318_vm6 = vcmp.le.f32.partialorder %v430_v35, 0.7853982  ;;  %v553_v53 = vsel %vm432_vm4, %v552_v54, %v551_v8  ;;  %v680_v43 = vadd.s32 1, %v676_v59  ;;  %v186_v37 = vor.u32 1065353216, %v182_v49 }
  0x9f   :  { %v1324_v38 = vor.u32 1065353216, %v183_v13  ;;  %v1326_v27 = vsub.s32 32, %v752_v20  ;;  %v1328_v63 = vmul.f32 -0.02, %v213_v47  ;;  %v1332_v31 = vmul.f32 %v1311_v60, %v1311_v60 }
  0xa0   :  { %v681_v16 = vsel %vm679_vm5, %v680_v43, %v676_v59  ;;  %v745_v35 = vand.u32 8388607, %v1580_v51  ;;  %v1339_v32 = vsel %vm1318_vm6, %v1023_v56, %v553_v53  ;;  %v1341_v21 = vshrl.u32 %v750_v58, 5 }
  0xa1   :  { %v682_v46 = vadd.s32 %v681_v16, %v677_v61  ;;  %v755_v26 = vshll.u32 %v997_v19, %v752_v20  ;;  %v756_v3 = vshrl.u32 %v998_v14, %v1326_v27  ;;  %v758_v10 = vshll.u32 %v998_v14, %v752_v20 }
  0xa2   :  { %v958_v50 = vpop.eup %957  ;;  %v759_v52 = vshrl.u32 %v999_v22, %v1326_v27  ;;  %v761_v36 = vshll.u32 %v999_v22, %v752_v20  ;;  %v762_v45 = vshrl.u32 %v1000_v25, %v1326_v27  ;;  %v764_v41 = vshll.u32 %v1000_v25, %v752_v20 }
  0xa3   :  { %v683_v4 = vadd.s32 536870912, %v682_v46  ;;  %v765_v8 = vshrl.u32 %v1001_v30, %v1326_v27  ;;  %v206_v5 = vsub.f32 2.0, %v186_v37  ;;  %v207_v29 = vsub.f32 2.0, %v1324_v38 }
  0xa4   :  { %v746_v15 = vor.u32 8388608, %v745_v35  ;;  %v767_v14 = vshll.u32 %v1001_v30, %v752_v20  ;;  %v215_v42 = vmul.f32 0.6931472, %v958_v50  ;;  %959 = vrsqrt.f32 %v1328_v63 }
  0xa5   :  { %v1358_v23 = vshrl.u32 %v683_v4, 30  ;;  %v768_v22 = vshrl.u32 %v1002_v39, %v1326_v27  ;;  %v412_v24 = vmul.f32 -0.00019511016, %v1332_v31  ;;  %v1365_v25 = vmul.f32 %v1339_v32, %v1339_v32 }
  0xa6   :  { %v1367_v48 = vor.u32 %v756_v3, %v755_v26  ;;  %v1369_v18 = vor.u32 %v759_v52, %v758_v10  ;;  %v763_v28 = vor.u32 %v762_v45, %v761_v36  ;;  %v766_v34 = vor.u32 %v765_v8, %v764_v41 }
  0xa7   :  { %v685_v30 = vshll.u32 %v1358_v23, 30  ;;  %vm770_vm7 = vcmp.lt.s32.totalorder %v1341_v21, 1  ;;  %961 = vlog2.f32 %v206_v5  ;;  %v769_v62 = vor.u32 %v768_v22, %v767_v14 }
  0xa8   :  { %vm773_vm8 = vcmp.lt.s32.totalorder %v1341_v21, 4  ;;  %v1374_v39 = vshll.u32 %v746_v15, 8  ;;  %v1376_v40 = vmul.f32 -0.02, %v215_v42  ;;  %v405_v54 = vmul.f32 -0.001358992, %v1332_v31 }
  0xa9   :  { %v686_v57 = vsub.s32 %v682_v46, %v685_v30  ;;  %vm772_vm9 = vcmp.lt.s32.totalorder %v1341_v21, 3  ;;  %v413_v49 = vadd.f32 0.008332121, %v412_v24  ;;  %v566_v13 = vmul.f32 -0.00019511016, %v1365_v25 }
  0xaa   :  { %vm771_vm10 = vcmp.lt.s32.totalorder %v1341_v21, 2  ;;  %v778_v58 = vsel %vm770_vm7, %v1367_v48, %v1369_v18  ;;  %v1386_v47 = vpop.eup %959  ;;  %v779_v61 = vsel %vm773_vm8, %v766_v34, 920167782  ;;  %v782_v20 = vsel %vm770_vm7, %v1369_v18, %v763_v28 }
  0xab   :  { %vm687_vm11 = vcmp.lt.s32.totalorder %v686_v57, 0  ;;  %v688_v59 = vsub.s32 0, %v686_v57  ;;  %v559_v53 = vmul.f32 -0.001358992, %v1365_v25  ;;  %v780_v43 = vsel %vm772_vm9, %v763_v28, %v779_v61 }
  0xac   :  { %v783_v37 = vsel %vm773_vm8, %v769_v62, 1326507024  ;;  %v787_v16 = vand.u32 65535, %v1374_v39  ;;  %v781_v46 = vsel %vm771_vm10, %v778_v58, %v780_v43  ;;  %v788_v50 = vshrl.u32 %v1374_v39, 16 }
  0xad   :  { %v689_v35 = vsel %vm687_vm11, %v688_v59, %v686_v57  ;;  %v784_v26 = vsel %vm772_vm9, %v766_v34, %v783_v37  ;;  %v1404_v3 = vpop.eup %961  ;;  %v567_v10 = vadd.f32 0.008332121, %v566_v13  ;;  %v811_v4 = vand.u32 65535, %v781_v46 }
  0xae   :  { %v690_v52 = vclz %v689_v35  ;;  %v785_v36 = vsel %vm771_vm10, %v782_v20, %v784_v26  ;;  %963 = vrsqrt.f32 %v1376_v40  ;;  %v812_v8 = vshrl.u32 %v781_v46, 16 }
  0xaf   :  { %v789_v45 = vand.u32 65535, %v785_v36  ;;  %v790_v41 = vshrl.u32 %v785_v36, 16  ;;  %v1411_v5 = vmul.f32 %v1386_v47, %v1328_v63  ;;  %v406_v15 = vadd.f32 0.041655596, %v405_v54 }
  0xb0   :  { %v414_v14 = vmul.f32 %v413_v49, %v1332_v31  ;;  %v942_v42 = vadd.s32 4294967294, %v690_v52  ;;  %v678_v22 = vadd.s32 %v1302_v17, %v1300_v9  ;;  %v560_v62 = vadd.f32 0.041655596, %v559_v53 }
  0xb1   :  { %v791_v24 = vmul.u32 %v789_v45, %v787_v16  ;;  %v792_v30 = vmul.u32 %v790_v41, %v787_v16  ;;  %v793_v34 = vmul.u32 %v789_v45, %v788_v50  ;;  %v568_v13 = vmul.f32 %v567_v10, %v1365_v25 }
  0xb2   :  { %vm943_vm12 = vcmp.lt.s32.totalorder %v942_v42, 0  ;;  %v815_v58 = vmul.u32 %v811_v4, %v788_v50  ;;  %v794_v61 = vmul.u32 %v790_v41, %v788_v50  ;;  %v814_v43 = vmul.u32 %v812_v8, %v787_v16 }
  0xb3   :  { %v693_v59 = vsel %vm943_vm12, 0, %v942_v42  ;;  %v795_v20 = vshll.u32 %v792_v30, 16  ;;  %v797_v49 = vshll.u32 %v793_v34, 16  ;;  %v754_v9 = vshrl.u32 %v997_v19, %v1326_v27 }
  0xb4   :  { %v694_v37 = vsub.s32 32, %v693_v59  ;;  %v695_v54 = vshll.u32 %v686_v57, %v693_v59  ;;  %v698_v35 = vsub.s32 4294967266, %v693_v59  ;;  %v1417_v46 = vpop.eup %963  ;;  %v775_v17 = vsel %vm773_vm8, %v763_v28, 2102212464 }
  0xb5   :  { %vm799_vm13 = vc.u32 %v791_v24, %v795_v20  ;;  %v813_v53 = vmul.u32 %v811_v4, %v787_v16  ;;  %v801_v36 = vadd.s32 %v795_v20, %v791_v24  ;;  %v796_v45 = vshrl.u32 %v792_v30, 16 }
  0xb6   :  { %v696_v26 = vshrl.u32 %v678_v22, %v694_v37  ;;  %v699_v10 = vadd.s32 127, %v698_v35  ;;  %v800_v52 = vsel %vm799_vm13, 1, %v1003_v44  ;;  %v816_v57 = vmul.u32 %v812_v8, %v788_v50 }
  0xb7   :  { %v802_v41 = vadd.s32 %v800_v52, %v794_v61  ;;  %v817_v42 = vshll.u32 %v814_v43, 16  ;;  %vm803_vm14 = vc.u32 %v801_v36, %v797_v49  ;;  %v819_v51 = vshll.u32 %v815_v58, 16 }
  0xb8   :  { %v697_v59 = vor.u32 %v696_v26, %v695_v54  ;;  %v700_v0 = vshll.u32 %v699_v10, 23  ;;  %v798_v7 = vshrl.u32 %v793_v34, 16  ;;  %v804_v19 = vsel %vm803_vm14, 1, %v1003_v44 }
  0xb9   :  { %vm821_vm15 = vc.u32 %v813_v53, %v817_v42  ;;  %v823_v27 = vadd.s32 %v817_v42, %v813_v53  ;;  %v806_v4 = vadd.s32 %v804_v19, %v802_v41  ;;  %v774_v24 = vsel %vm770_vm7, %v754_v9, %v1367_v48 }
  0xba   :  { %v701_v28 = vor.u32 4788187, %v700_v0  ;;  %v704_v16 = vcvt.s32.f32 %v697_v59  ;;  %v822_v22 = vsel %vm821_vm15, 1, %v1003_v44  ;;  %v818_v50 = vshrl.u32 %v814_v43, 16 }
  0xbb   :  { %v824_v8 = vadd.s32 %v822_v22, %v816_v57  ;;  %vm825_vm0 = vc.u32 %v823_v27, %v819_v51  ;;  %v776_v34 = vsel %vm772_vm9, %v1369_v18, %v775_v17  ;;  %v807_v61 = vadd.s32 %v806_v4, %v796_v45 }
  0xbc   :  { %v702_v30 = vand.u32 2147483647, %v701_v28  ;;  %v826_v20 = vsel %vm825_vm0, 1, %v1003_v44  ;;  %v237_v0 = vmul.f32 %v1417_v46, %v1376_v40  ;;  %v400_v37 = vsub.s32 4, %v1127_v6 }
  0xbd   :  { %v820_v54 = vshrl.u32 %v815_v58, 16  ;;  %v828_v35 = vadd.s32 %v826_v20, %v824_v8  ;;  %v407_v48 = vmul.f32 %v406_v15, %v1332_v31  ;;  %v1437_v49 = vadd.s32 %v807_v61, %v798_v7 }
  0xbe   :  { %v705_v43 = vmul.f32 %v704_v16, %v702_v30  ;;  %v1439_v9 = vadd.s32 %v823_v27, %v819_v51  ;;  %v415_v53 = vadd.f32 -0.16666654, %v414_v14  ;;  %v561_v18 = vmul.f32 %v560_v62, %v1365_v25 }
  0xbf   :  { %v777_v44 = vsel %vm771_vm10, %v774_v24, %v776_v34  ;;  %v829_v17 = vadd.s32 %v828_v35, %v818_v50  ;;  %965 = vlog2.f32 %v207_v29  ;;  %v226_v58 = vmul.f32 %v1386_v47, %v1411_v5 }
  0xc0   :  { %v569_v26 = vadd.f32 -0.16666654, %v568_v13  ;;  %v238_v15 = vmul.f32 %v1417_v46, %v237_v0  ;;  %v401_v7 = vsel %vm278_vm1, %v400_v37, %v1127_v6  ;;  %vm586_vm3 = vcmp.lt.s32.totalorder %v1066_v12, 0 }
  0xc1   :  { %v830_v51 = vadd.s32 %v829_v17, %v820_v54  ;;  %v554_v21 = vsub.s32 4, %v1199_v55  ;;  %v706_v14 = vxor.u32 2147483648, %v705_v43  ;;  %v831_v62 = vmul.u32 %v1374_v39, %v777_v44 }
  0xc2   :  { %vm833_vm5 = vc.u32 %v1437_v49, %v1439_v9  ;;  %v408_v38 = vadd.f32 -0.4999988, %v407_v48  ;;  %v416_v29 = vmul.f32 %v415_v53, %v1332_v31  ;;  %v562_v5 = vadd.f32 -0.4999988, %v561_v18 }
  0xc3   :  { %v834_v13 = vadd.s32 1, %v830_v51  ;;  %v570_v10 = vmul.f32 %v569_v26, %v1365_v25  ;;  %v227_v52 = vmul.f32 0.5, %v226_v58  ;;  %v239_v6 = vmul.f32 0.5, %v238_v15 }
  0xc4   :  { %v403_v41 = vsel %vm1294_vm2, 0, %v401_v7  ;;  %v1586_v57 = vand.u32 2147483647, %v1066_v12  ;;  %v707_v42 = vsel %vm586_vm3, %v706_v14, %v705_v43  ;;  %v409_v19 = vmul.f32 %v408_v38, %v1332_v31 }
  0xc5   :  { %v835_v36 = vsel %vm833_vm5, %v834_v13, %v830_v51  ;;  %v966_v45 = vpop.eup %965  ;;  %v417_v27 = vadd.f32 1.0, %v416_v29  ;;  %v555_v28 = vsel %vm432_vm4, %v554_v21, %v1199_v55  ;;  %v563_v11 = vmul.f32 %v562_v5, %v1365_v25 }
  0xc6   :  { %vm1463_vm1 = vcmp.le.f32.partialorder %v1586_v57, 0.7853982  ;;  %v836_v59 = vadd.s32 %v835_v36, %v831_v62  ;;  %v217_v16 = vmul.f32 0.6931472, %v1404_v3  ;;  %v571_v4 = vadd.f32 1.0, %v570_v10 }
  0xc7   :  { %v219_v24 = vmul.f32 0.6931472, %v966_v45  ;;  %v228_v50 = vsub.f32 1.5, %v227_v52  ;;  %v1478_v8 = vsel %vm1463_vm1, %v1066_v12, %v707_v42  ;;  %v240_v30 = vsub.f32 1.5, %v239_v6 }
  0xc8   :  { %v837_v22 = vadd.s32 536870912, %v836_v59  ;;  %v420_v31 = vand.u32 3, %v403_v41  ;;  %v557_v34 = vsel %vm1318_vm6, 0, %v555_v28  ;;  %v410_v55 = vadd.f32 1.0, %v409_v19 }
  0xc9   :  { %v418_v25 = vmul.f32 %v417_v27, %v1311_v60  ;;  %v564_v3 = vadd.f32 1.0, %v563_v11  ;;  %v1485_v20 = vmul.f32 -0.02, %v217_v16  ;;  %v572_v0 = vmul.f32 %v571_v4, %v1339_v32 }
  0xca   :  { %v1482_v61 = vshrl.u32 %v837_v22, 30  ;;  %v1490_v37 = vmul.f32 %v1478_v8, %v1478_v8  ;;  %v1493_v35 = vmul.f32 -0.02, %v219_v24  ;;  %vm231_vm2 = vcmp.eq.f32.partialorder %v1328_v63, inf }
  0xcb   :  { %v234_v2 = vand.u32 2147483648, %v1328_v63  ;;  %v574_v48 = vand.u32 3, %v557_v34  ;;  %v229_v60 = vmul.f32 %v1386_v47, %v228_v50  ;;  %v241_v43 = vmul.f32 %v1417_v46, %v240_v30 }
  0xcc   :  { %v839_v54 = vshll.u32 %v1482_v61, 30  ;;  %vm422_vm4 = vcmp.eq.s32.totalorder %v420_v31, 0  ;;  %vm233_vm6 = vcmp.eq.f32.partialorder %v1328_v63, 0.0  ;;  %v423_v32 = vxor.u32 2147483648, %v418_v25 }
  0xcd   :  { %vm425_vm7 = vcmp.eq.s32.totalorder %v420_v31, 2  ;;  %v426_v18 = vxor.u32 2147483648, %v410_v55  ;;  %v580_v44 = vxor.u32 2147483648, %v564_v3  ;;  %v577_v17 = vxor.u32 2147483648, %v572_v0 }
  0xce   :  { %v840_v53 = vsub.s32 %v836_v59, %v839_v54  ;;  %v720_v58 = vmul.f32 -0.00019511016, %v1490_v37  ;;  %vm243_vm9 = vcmp.eq.f32.partialorder %v1376_v40, inf  ;;  %967 = vrsqrt.f32 %v1485_v20 }
  0xcf   :  { %vm576_vm10 = vcmp.eq.s32.totalorder %v574_v48, 0  ;;  %vm579_vm11 = vcmp.eq.s32.totalorder %v574_v48, 2  ;;  %v230_v47 = vmul.f32 %v229_v60, %v1328_v63  ;;  %v242_v46 = vmul.f32 %v241_v43, %v1376_v40 }
  0xd0   :  { %vm841_vm8 = vcmp.lt.s32.totalorder %v840_v53, 0  ;;  %v842_v26 = vsub.s32 0, %v840_v53  ;;  %vm421_vm12 = vcmp.lt.s32.totalorder %v420_v31, 2  ;;  %v424_v7 = vsel %vm422_vm4, %v410_v55, %v423_v32 }
  0xd1   :  { %v427_v51 = vsel %vm425_vm7, %v426_v18, %v418_v25  ;;  %vm575_vm13 = vcmp.lt.s32.totalorder %v574_v48, 2  ;;  %v578_v14 = vsel %vm576_vm10, %v564_v3, %v577_v17  ;;  %v581_v62 = vsel %vm579_vm11, %v580_v44, %v572_v0 }
  0xd2   :  { %v843_v15 = vsel %vm841_vm8, %v842_v26, %v840_v53  ;;  %v713_v38 = vmul.f32 -0.001358992, %v1490_v37  ;;  %v721_v29 = vadd.f32 0.008332121, %v720_v58  ;;  %vm245_vm14 = vcmp.eq.f32.partialorder %v1376_v40, 0.0 }
  0xd3   :  { %v844_v21 = vclz %v843_v15  ;;  %v246_v5 = vand.u32 2147483648, %v1376_v40  ;;  %969 = vrsqrt.f32 %v1493_v35  ;;  %v232_v10 = vsel %vm231_vm2, %v1328_v63, %v230_v47 }
  0xd4   :  { %v244_v52 = vsel %vm243_vm9, %v1376_v40, %v242_v46  ;;  %vm419_vm15 = vweird.f32 %v1020_v33  ;;  %vm573_vm0 = vweird.f32 %v1023_v56  ;;  %v968_v6 = vpop.eup %967  ;;  %v428_v36 = vsel %vm421_vm12, %v424_v7, %v427_v51 }
  0xd5   :  { %v945_v13 = vadd.s32 4294967294, %v844_v21  ;;  %v582_v45 = vsel %vm575_vm13, %v578_v14, %v581_v62  ;;  %v832_v41 = vadd.s32 %v1439_v9, %v1437_v49  ;;  %v714_v57 = vadd.f32 0.041655596, %v713_v38 }
  0xd6   :  { %v722_v42 = vmul.f32 %v721_v29, %v1490_v37  ;;  %v235_v33 = vsel %vm233_vm6, %v234_v2, %v232_v10  ;;  %v247_v56 = vsel %vm245_vm14, %v246_v5, %v244_v52  ;;  %v429_v11 = vsel %vm419_vm15, nan, %v428_v36 }
  0xd7   :  { %vm946_vm5 = vcmp.lt.s32.totalorder %v945_v13, 0  ;;  %v583_v16 = vsel %vm573_vm0, nan, %v582_v45  ;;  %v249_v49 = vmul.f32 %v968_v6, %v1485_v20  ;;  %v715_v9 = vmul.f32 %v714_v57, %v1490_v37 }
  0xd8   :  { %v847_v59 = vsel %vm946_vm5, 0, %v945_v13  ;;  %v723_v50 = vadd.f32 -0.16666654, %v722_v42  ;;  %v892_v34 = vmul.f32 %v429_v11, %v235_v33  ;;  %v893_v55 = vmul.f32 %v583_v16, %v247_v56 }
  0xd9   :  { %v848_v19 = vsub.s32 32, %v847_v59  ;;  %v849_v27 = vshll.u32 %v840_v53, %v847_v59  ;;  %v852_v28 = vsub.s32 4294967266, %v847_v59  ;;  %v970_v4 = vpop.eup %969  ;;  %v250_v0 = vmul.f32 %v968_v6, %v249_v49 }
  0xda   :  { %v900_v3 = vrot.slane %v893_v55, 7  ;;  %v261_v40 = vmul.f32 %v970_v4, %v1493_v35  ;;  %v708_v54 = vsub.s32 4, %v1358_v23  ;;  %vm903_vm2 = vcmask 1040384  }
  0xdb   :  { %v850_v22 = vshrl.u32 %v832_v41, %v848_v19  ;;  %v853_v24 = vadd.s32 127, %v852_v28  ;;  %v716_v2 = vadd.f32 -0.4999988, %v715_v9  ;;  %v724_v48 = vmul.f32 %v723_v50, %v1490_v37 }
  0xdc   :  { %v1533_v43 = vsel %vm903_vm2, %v892_v34, %v900_v3  ;;  %v251_v32 = vmul.f32 0.5, %v250_v0  ;;  %v262_v18 = vmul.f32 %v970_v4, %v261_v40  ;;  %v709_v44 = vsel %vm586_vm3, %v708_v54, %v1358_v23 }
  0xdd   :  { %v851_v30 = vor.u32 %v850_v22, %v849_v27  ;;  %v854_v31 = vshll.u32 %v853_v24, 23  ;;  %vm740_vm4 = vcmp.lt.s32.totalorder %v1261_v1, 0  ;;  %v717_v17 = vmul.f32 %v716_v2, %v1490_v37 }
  0xde   :  { %v725_v58 = vadd.f32 1.0, %v724_v48  ;;  %v1589_v26 = vand.u32 2147483647, %v1261_v1  ;;  %v711_v15 = vsel %vm1463_vm1, 0, %v709_v44  ;;  %v252_v51 = vsub.f32 1.5, %v251_v32 }
  0xdf   :  { %v855_v25 = vor.u32 4788187, %v854_v31  ;;  %v858_v63 = vcvt.s32.f32 %v851_v30  ;;  %v263_v23 = vmul.f32 0.5, %v262_v18  ;;  %v862_v21 = vsub.s32 4, %v1482_v61 }
  0xe0   :  { %vm1542_vm6 = vcmp.le.f32.partialorder %v1589_v26, 0.7853982  ;;  %v718_v14 = vadd.f32 1.0, %v717_v17  ;;  %v726_v62 = vmul.f32 %v725_v58, %v1478_v8  ;;  %v728_v29 = vand.u32 3, %v711_v15 }
  0xe1   :  { %v856_v60 = vand.u32 2147483647, %v855_v25  ;;  %v253_v39 = vmul.f32 %v968_v6, %v252_v51  ;;  %v264_v10 = vsub.f32 1.5, %v263_v23  ;;  %v863_v52 = vsel %vm740_vm4, %v862_v21, %v1482_v61 }
  0xe2   :  { %v731_v36 = vxor.u32 2147483648, %v726_v62  ;;  %v734_v45 = vxor.u32 2147483648, %v718_v14  ;;  %vm730_vm3 = vcmp.eq.s32.totalorder %v728_v29, 0  ;;  %vm733_vm1 = vcmp.eq.s32.totalorder %v728_v29, 2 }
  0xe3   :  { %v859_v53 = vmul.f32 %v858_v63, %v856_v60  ;;  %v865_v42 = vsel %vm1542_vm6, 0, %v863_v52  ;;  %v254_v19 = vmul.f32 %v253_v39, %v1485_v20  ;;  %vm255_vm7 = vcmp.eq.f32.partialorder %v1485_v20, inf }
  0xe4   :  { %v265_v6 = vmul.f32 %v970_v4, %v264_v10  ;;  %vm729_vm8 = vcmp.lt.s32.totalorder %v728_v29, 2  ;;  %v732_v27 = vsel %vm730_vm3, %v718_v14, %v731_v36  ;;  %v735_v28 = vsel %vm733_vm1, %v734_v45, %v726_v62 }
  0xe5   :  { %v860_v46 = vxor.u32 2147483648, %v859_v53  ;;  %v882_v56 = vand.u32 3, %v865_v42  ;;  %vm257_vm9 = vcmp.eq.f32.partialorder %v1485_v20, 0.0  ;;  %v258_v11 = vand.u32 2147483648, %v1485_v20 }
  0xe6   :  { %v256_v24 = vsel %vm255_vm7, %v1485_v20, %v254_v19  ;;  %v266_v49 = vmul.f32 %v265_v6, %v1493_v35  ;;  %vm727_vm10 = vweird.f32 %v1066_v12  ;;  %v736_v9 = vsel %vm729_vm8, %v732_v27, %v735_v28 }
  0xe7   :  { %v861_v7 = vsel %vm740_vm4, %v860_v46, %v859_v53  ;;  %vm267_vm11 = vcmp.eq.f32.partialorder %v1493_v35, inf  ;;  %v270_v30 = vand.u32 2147483648, %v1493_v35  ;;  %vm887_vm12 = vcmp.eq.s32.totalorder %v882_v56, 2 }
  0xe8   :  { %v864_v37 = vsel %vm1542_vm6, %v1261_v1, %v861_v7  ;;  %v259_v31 = vsel %vm257_vm9, %v258_v11, %v256_v24  ;;  %v737_v34 = vsel %vm727_vm10, nan, %v736_v9  ;;  %v268_v63 = vsel %vm267_vm11, %v1493_v35, %v266_v49 }
  0xe9   :  { %v866_v38 = vmul.f32 %v864_v37, %v864_v37  ;;  %vm269_vm13 = vcmp.eq.f32.partialorder %v1493_v35, 0.0  ;;  %vm884_vm14 = vcmp.eq.s32.totalorder %v882_v56, 0  ;;  %vm883_vm15 = vcmp.lt.s32.totalorder %v882_v56, 2 }
  0xea   :  { %vm881_vm0 = vweird.f32 %v1261_v1  ;;  %v894_v3 = vmul.f32 %v737_v34, %v259_v31  ;;  %v271_v0 = vsel %vm269_vm13, %v270_v30, %v268_v63  ;;  %vm905_vm5 = vcmask 1042434  }
  0xeb   :  { %v867_v5 = vmul.f32 -0.001358992, %v866_v38  ;;  %v874_v13 = vmul.f32 -0.00019511016, %v866_v38  ;;  %vm907_vm2 = vcmask 1041408   ;;  %v1592_v53 = vlaneseq }
  0xec   :  { %v901_v60 = vrot.slane %v894_v3, 6 }
  0xed   :  { %v868_v41 = vadd.f32 0.041655596, %v867_v5  ;;  %v875_v57 = vadd.f32 0.008332121, %v874_v13  ;;  %vm912_vm4 = vcmp.lt.s32.totalorder %v1592_v53, 512 }
  0xef   :  { %v869_v8 = vmul.f32 %v868_v41, %v866_v38  ;;  %v876_v59 = vmul.f32 %v875_v57, %v866_v38 }
  0xf1   :  { %v870_v61 = vadd.f32 -0.4999988, %v869_v8  ;;  %v877_v33 = vadd.f32 -0.16666654, %v876_v59 }
  0xf3   :  { %v871_v16 = vmul.f32 %v870_v61, %v866_v38  ;;  %v878_v22 = vmul.f32 %v877_v33, %v866_v38 }
  0xf5   :  { %v872_v4 = vadd.f32 1.0, %v871_v16  ;;  %v879_v50 = vadd.f32 1.0, %v878_v22 }
  0xf7   :  { %v880_v55 = vmul.f32 %v879_v50, %v864_v37  ;;  %v888_v25 = vxor.u32 2147483648, %v872_v4 }
  0xf9   :  { %v885_v20 = vxor.u32 2147483648, %v880_v55  ;;  %v889_v12 = vsel %vm887_vm12, %v888_v25, %v880_v55 }
  0xfb   :  { %v886_v40 = vsel %vm884_vm14, %v872_v4, %v885_v20 }
  0xfc   :  { %v890_v54 = vsel %vm883_vm15, %v886_v40, %v889_v12 }
  0xfd   :  { %v891_v2 = vsel %vm881_vm0, nan, %v890_v54 }
  0xfe   :  { %v895_v48 = vmul.f32 %v891_v2, %v271_v0 }
 0x100   :  { %v902_v35 = vrot.slane %v895_v48, 5 }
 0x102   :  { %v906_v32 = vsel %vm905_vm5, %v901_v60, %v902_v35 }
 0x103   :  { %v908_v1 = vsel %vm907_vm2, %v1533_v43, %v906_v32 }
 0x104   :  { %914 = vst.msk [vmem:[#allocation4] sm:$0xf] %vm912_vm4, %v908_v1 }
 0x105   :  { %925 = dma.vmem_to_hbm [thread:$0]  %s921_s27, 64, %s923_s30, [#allocation5]  }
 0x106   :  { %995 = dma.done.wait [#allocation5], 64  }
 0x107   :  { %996 = vsyncadd [#allocation5], 4294967232 }
 0x108   :  { %930 = vsyncpa [#allocation5], 1 }

</bundles_post_ra>
